<compile_context>
chip_gen: v7x
topology: tpu7x:2x2x1
jax: 0.10.0
libtpu: 0.0.40
codegen_flags: <defaults>
</compile_context>

<pallas_src>
import functools

import jax
import jax.numpy as jnp
import numpy as np
from jax.experimental import pallas as pl
from jax.experimental.pallas import tpu as pltpu


def _branch_kernel(nf_ref, f0_ref, adj_ref, ws_ref, wncol_ref, out_ref, *, agg_max):
    nf = nf_ref[...]            # (bm, D)        f32
    adj = adj_ref[...]          # (bm, N_other)  f32, streamed directly (no cast)
    f0 = f0_ref[...]            # (1, N_other)   f32, lane-dense

    if agg_max:
        # max over neighbors of feature 0 of the other node set; rows with no
        # neighbors reduce to -inf and are forced back to 0.
        masked = jnp.where(adj > 0.0,
                           jnp.broadcast_to(f0, adj.shape),
                           jnp.full(adj.shape, -jnp.inf, dtype=jnp.float32))
        mx = jnp.max(masked, axis=1, keepdims=True)           # (bm, 1)
        neigh = jnp.where(mx > -jnp.inf, mx, 0.0)
    else:
        # sum over neighbors of feature 0: VPU mask + lane reduce; empty sum
        # is already 0, so no has-neighbor test is needed.
        masked = jnp.where(adj > 0.0, jnp.broadcast_to(f0, adj.shape), 0.0)
        neigh = jnp.sum(masked, axis=1, keepdims=True)        # (bm, 1)

    # rank-1 neighbor term: (scalar-per-row broadcast over D) @ Wn
    #   == neigh (bm,1) * colsum(Wn) (1, OUT_pad)   (colsum hoisted to wrapper)
    o = jnp.dot(nf, ws_ref[...], preferred_element_type=jnp.float32)
    o = o + neigh * wncol_ref[...]
    out_ref[...] = jnp.maximum(o, 0.0)          # ReLU, lane-dense store


def _vmem_config():
    """Generation-aware (scoped-limit, tile-budget) in bytes."""
    cap = 64 << 20          # conservative fallback = v7x physical VMEM per TC
    try:
        cap = int(pltpu.get_tpu_info().vmem_capacity_bytes)
    except Exception:       # non-TPU tracing / older runtime: keep fallback
        pass
    limit = min((cap * 3) // 4, 96 << 20)     # requested scoped VMEM limit
    budget = max(limit - (8 << 20), 8 << 20)  # tile-sizing budget (headroom)
    return limit, budget


def _pick_block_rows(n_rows, n_other, d, out_pad, budget, *, tm_max=2048, min_steps=4):
    # Fixed resident operands (double-buffered by BlockSpec; 1-row blocks still
    # pad to 8 sublanes): f0 (1,N_other), W_self^T (D,OUT_pad), wn_col (1,OUT_pad).
    fixed = 2 * 4 * (8 * n_other + d * out_pad + 8 * out_pad)
    # Per-row streaming operands: adjacency + node feats + padded output,
    # double-buffered, plus headroom for the f32 masked intermediate tile.
    per_row = 2 * 4 * (n_other + d + out_pad) + 2 * 4 * n_other
    avail = max(budget - fixed, per_row * 8)
    bm = min(tm_max, avail // per_row, n_rows)
    # Guarantee a multi-step grid on large inputs so the "parallel" axis shards
    # across v7x's 2 TensorCores and DMA/compute overlap actually engages.
    if n_rows >= 8 * min_steps:
        bm = min(bm, pl.cdiv(n_rows, min_steps))
    bm = max(8, (bm // 8) * 8)                # sublane multiple
    return int(bm)


def _run_branch(nf_self, f0_other, adj, ws_t, wn_col, *, agg_max, vmem_limit, budget):
    n_rows, d = nf_self.shape
    n_other = adj.shape[1]
    out_pad = ws_t.shape[1]

    bm = _pick_block_rows(n_rows, n_other, d, out_pad, budget)
    grid = (pl.cdiv(n_rows, bm),)

    kern = functools.partial(_branch_kernel, agg_max=agg_max)
    return pl.pallas_call(
        kern,
        out_shape=jax.ShapeDtypeStruct((n_rows, out_pad), jnp.float32),
        grid_spec=pltpu.PrefetchScalarGridSpec(
            num_scalar_prefetch=0,
            grid=grid,
            in_specs=[
                pl.BlockSpec((bm, d), lambda i: (i, 0)),         # self node feats
                pl.BlockSpec((1, n_other), lambda i: (0, 0)),    # other-set feature 0 (lane-dense)
                pl.BlockSpec((bm, n_other), lambda i: (i, 0)),   # adjacency rows (f32)
                pl.BlockSpec((d, out_pad), lambda i: (0, 0)),    # W_self^T (zero-padded)
                pl.BlockSpec((1, out_pad), lambda i: (0, 0)),    # colsum(W_neigh^T)
            ],
            out_specs=pl.BlockSpec((bm, out_pad), lambda i: (i, 0)),
        ),
        compiler_params=pltpu.CompilerParams(
            dimension_semantics=("parallel",),       # megacore / 2-TC sharding
            vmem_limit_bytes=vmem_limit),
    )(nf_self, f0_other, adj, ws_t, wn_col)


@jax.jit
def gnn_dual_layer(node_feats1, node_feats2, adj_1to2, adj_2to1,
                   w1_self, w1_neigh, w2_self, w2_neigh):
    """w*_self / w*_neigh have PyTorch Linear layout (output_dim, input_dim)."""
    n1, d = node_feats1.shape
    n2, _ = node_feats2.shape
    out_dim = w1_self.shape[0]
    out_pad = ((out_dim + 127) // 128) * 128   # lane-dense padded output width

    vmem_limit, budget = _vmem_config()

    def prep_ws(w):      # (OUT, D) -> (D, OUT_pad), zero-padded extra columns
        wt = jnp.transpose(w).astype(jnp.float32)
        return jnp.pad(wt, ((0, 0), (0, out_pad - out_dim)))

    def prep_wn_col(w):  # (OUT, D) -> (1, OUT_pad): hoisted colsum of W_neigh^T
        col = jnp.sum(w.astype(jnp.float32), axis=1)          # (OUT,)
        return jnp.pad(col, (0, out_pad - out_dim)).reshape(1, out_pad)

    w1s = prep_ws(w1_self)
    w2s = prep_ws(w2_self)
    w1n_col = prep_wn_col(w1_neigh)
    w2n_col = prep_wn_col(w2_neigh)

    # Feature-0 vectors, lane-dense (1, N_other) for BOTH branches.
    f0_2 = jnp.transpose(node_feats2[:, 0:1]).astype(jnp.float32)   # (1, N2)
    f0_1 = jnp.transpose(node_feats1[:, 0:1]).astype(jnp.float32)   # (1, N1)

    # Adjacency streamed as f32 directly (no per-call transport cast; the
    # astype is a no-op when the caller already provides f32 0/1 adjacency).
    adj21 = adj_2to1.astype(jnp.float32)   # (N1, N2)
    adj12 = adj_1to2.astype(jnp.float32)   # (N2, N1)

    nf1 = node_feats1.astype(jnp.float32)
    nf2 = node_feats2.astype(jnp.float32)

    out1_pad = _run_branch(nf1, f0_2, adj21, w1s, w1n_col,
                           agg_max=True, vmem_limit=vmem_limit, budget=budget)
    out2_pad = _run_branch(nf2, f0_1, adj12, w2s, w2n_col,
                           agg_max=False, vmem_limit=vmem_limit, budget=budget)
    return out1_pad[:, :out_dim], out2_pad[:, :out_dim]


def _reference(nf1, nf2, adj12, adj21, w1s, w1n, w2s, w2n):
    """Pure-JAX mirror of the PyTorch forward for validation."""
    m1 = adj21 > 0
    mx = jnp.max(jnp.where(m1, nf2[:, 0][None, :], -jnp.inf), axis=1)
    na1 = jnp.where(jnp.any(m1, axis=1), mx, 0.0)[:, None] * jnp.ones_like(nf1)
    m2 = adj12 > 0
    sm = jnp.sum(jnp.where(m2, nf1[:, 0][None, :], 0.0), axis=1)
    na2 = jnp.where(jnp.any(m2, axis=1), sm, 0.0)[:, None] * jnp.ones_like(nf2)
    o1 = jnp.maximum(nf1 @ w1s.T + na1 @ w1n.T, 0.0)
    o2 = jnp.maximum(nf2 @ w2s.T + na2 @ w2n.T, 0.0)
    return o1, o2


if __name__ == "__main__":
    N1, N2, D, OUT = 8, 12, 8, 16

    key = jax.random.PRNGKey(0)
    k_f1, k_f2, k_a12, k_a21, k_w1s, k_w1n, k_w2s, k_w2n = jax.random.split(key, 8)

    node_feats1 = jax.random.normal(k_f1, (N1, D), dtype=jnp.float32)
    node_feats2 = jax.random.normal(k_f2, (N2, D), dtype=jnp.float32)
    adj_1to2 = jax.random.bernoulli(k_a12, 0.4, (N2, N1)).astype(jnp.float32)
    adj_2to1 = jax.random.bernoulli(k_a21, 0.4, (N1, N2)).astype(jnp.float32)

    # nn.Linear(input_dim, output_dim, bias=False) -> weight shape (OUT, D)
    bound = 1.0 / np.sqrt(D)
    w1_self = jax.random.uniform(k_w1s, (OUT, D), jnp.float32, -bound, bound)
    w1_neigh = jax.random.uniform(k_w1n, (OUT, D), jnp.float32, -bound, bound)
    w2_self = jax.random.uniform(k_w2s, (OUT, D), jnp.float32, -bound, bound)
    w2_neigh = jax.random.uniform(k_w2n, (OUT, D), jnp.float32, -bound, bound)

    out1, out2 = gnn_dual_layer(node_feats1, node_feats2, adj_1to2, adj_2to1,
                                w1_self, w1_neigh, w2_self, w2_neigh)
    jax.block_until_ready((out1, out2))

    ref1, ref2 = _reference(node_feats1, node_feats2, adj_1to2, adj_2to1,
                            w1_self, w1_neigh, w2_self, w2_neigh)
    np.testing.assert_allclose(np.asarray(out1), np.asarray(ref1), rtol=1e-5, atol=1e-5)
    np.testing.assert_allclose(np.asarray(out2), np.asarray(ref2), rtol=1e-5, atol=1e-5)

    print("KERNEL_OK")
</pallas_src>

<mosaic_0001>
module attributes {stable_mosaic.version = 11 : i64} {
  func.func @_branch_kernel(%arg0: i32, %arg1: memref<8x8xf32, #tpu.memory_space<vmem>>, %arg2: memref<1x8xf32, #tpu.memory_space<vmem>>, %arg3: memref<8x8xf32, #tpu.memory_space<vmem>>, %arg4: memref<8x128xf32, #tpu.memory_space<vmem>>, %arg5: memref<1x128xf32, #tpu.memory_space<vmem>>, %arg6: memref<8x128xf32, #tpu.memory_space<vmem>>) attributes {dimension_semantics = [#tpu.dimension_semantics<parallel>], iteration_bounds = array<i64: 2>, scalar_prefetch = 0 : i64, scratch_operands = 0 : i64, tpu.core_type = #tpu.core_type<tc>, window_params = [{transform_indices = @transform_0, window_bounds = array<i64: 8, 8>}, {pipeline_mode = #tpu.pipeline_mode<synchronous>, transform_indices = @transform_1, window_bounds = array<i64: 1, 8>}, {transform_indices = @transform_2, window_bounds = array<i64: 8, 8>}, {pipeline_mode = #tpu.pipeline_mode<synchronous>, transform_indices = @transform_3, window_bounds = array<i64: 8, 128>}, {pipeline_mode = #tpu.pipeline_mode<synchronous>, transform_indices = @transform_4, window_bounds = array<i64: 1, 128>}, {transform_indices = @transform_5, window_bounds = array<i64: 8, 128>}]} {
    %c0 = arith.constant 0 : index
    %c0_0 = arith.constant 0 : index
    %0 = vector.load %arg1[%c0, %c0_0] : memref<8x8xf32, #tpu.memory_space<vmem>>, vector<8x8xf32>
    %c0_1 = arith.constant 0 : index
    %c0_2 = arith.constant 0 : index
    %1 = vector.load %arg3[%c0_1, %c0_2] : memref<8x8xf32, #tpu.memory_space<vmem>>, vector<8x8xf32>
    %c0_3 = arith.constant 0 : index
    %c0_4 = arith.constant 0 : index
    %2 = vector.load %arg2[%c0_3, %c0_4] : memref<1x8xf32, #tpu.memory_space<vmem>>, vector<1x8xf32>
    %cst = arith.constant 0.000000e+00 : f32
    %3 = vector.broadcast %cst : f32 to vector<8x8xf32>
    %4 = arith.cmpf ogt, %1, %3 : vector<8x8xf32>
    %5 = vector.shape_cast %2 : vector<1x8xf32> to vector<1x8xf32>
    %6 = vector.broadcast %5 : vector<1x8xf32> to vector<8x8xf32>
    %cst_5 = arith.constant 0.000000e+00 : f32
    %7 = vector.broadcast %cst_5 : f32 to vector<8x8xf32>
    %8 = arith.select %4, %6, %7 : vector<8x8xi1>, vector<8x8xf32>
    %cst_6 = arith.constant dense<0.000000e+00> : vector<8xf32>
    %9 = vector.multi_reduction <add>, %8, %cst_6 [1] : vector<8x8xf32> to vector<8xf32>
    %10 = vector.shape_cast %9 : vector<8xf32> to vector<8x1xf32>
    %c0_7 = arith.constant 0 : index
    %c0_8 = arith.constant 0 : index
    %11 = vector.load %arg4[%c0_7, %c0_8] : memref<8x128xf32, #tpu.memory_space<vmem>>, vector<8x128xf32>
    %cst_9 = arith.constant dense<0.000000e+00> : vector<8x128xf32>
    %12 = tpu.matmul %0, %11, %cst_9 {dimension_numbers = #tpu.dot_dimension_numbers<[1], [0], [0], [1], [0, 0, 1, 1], [], []>} : vector<8x8xf32>, vector<8x128xf32>, vector<8x128xf32> -> vector<8x128xf32>
    %c0_10 = arith.constant 0 : index
    %c0_11 = arith.constant 0 : index
    %13 = vector.load %arg5[%c0_10, %c0_11] : memref<1x128xf32, #tpu.memory_space<vmem>>, vector<1x128xf32>
    %14 = vector.broadcast %10 : vector<8x1xf32> to vector<8x128xf32>
    %15 = vector.broadcast %13 : vector<1x128xf32> to vector<8x128xf32>
    %16 = arith.mulf %14, %15 : vector<8x128xf32>
    %17 = arith.addf %12, %16 : vector<8x128xf32>
    %cst_12 = arith.constant 0.000000e+00 : f32
    %18 = vector.broadcast %cst_12 : f32 to vector<8x128xf32>
    %19 = arith.maximumf %17, %18 : vector<8x128xf32>
    %c0_13 = arith.constant 0 : index
    %c0_14 = arith.constant 0 : index
    %20 = vector.load %arg6[%c0_13, %c0_14] : memref<8x128xf32, #tpu.memory_space<vmem>>, vector<8x128xf32>
    tpu.vector_store %arg6[%c0_13, %c0_14], %19 {strides = array<i32>} : memref<8x128xf32, #tpu.memory_space<vmem>>, vector<8x128xf32>,
    return
  }
  func.func @transform_0(%arg0: i32) -> (i32, i32) {
    %c0_i32 = arith.constant 0 : i32
    %c0_i32_0 = arith.constant 0 : i32
    return %arg0, %c0_i32 : i32, i32
  }
  func.func @transform_1(%arg0: i32) -> (i32, i32) {
    %c0_i32 = arith.constant 0 : i32
    %c0_i32_0 = arith.constant 0 : i32
    %c0_i32_1 = arith.constant 0 : i32
    return %c0_i32, %c0_i32_0 : i32, i32
  }
  func.func @transform_2(%arg0: i32) -> (i32, i32) {
    %c0_i32 = arith.constant 0 : i32
    %c0_i32_0 = arith.constant 0 : i32
    return %arg0, %c0_i32 : i32, i32
  }
  func.func @transform_3(%arg0: i32) -> (i32, i32) {
    %c0_i32 = arith.constant 0 : i32
    %c0_i32_0 = arith.constant 0 : i32
    %c0_i32_1 = arith.constant 0 : i32
    return %c0_i32, %c0_i32_0 : i32, i32
  }
  func.func @transform_4(%arg0: i32) -> (i32, i32) {
    %c0_i32 = arith.constant 0 : i32
    %c0_i32_0 = arith.constant 0 : i32
    %c0_i32_1 = arith.constant 0 : i32
    return %c0_i32, %c0_i32_0 : i32, i32
  }
  func.func @transform_5(%arg0: i32) -> (i32, i32) {
    %c0_i32 = arith.constant 0 : i32
    %c0_i32_0 = arith.constant 0 : i32
    return %arg0, %c0_i32 : i32, i32
  }
}

module attributes {stable_mosaic.version = 11 : i64} {
  func.func @_branch_kernel(%arg0: i32, %arg1: memref<8x8xf32, #tpu.memory_space<vmem>>, %arg2: memref<1x12xf32, #tpu.memory_space<vmem>>, %arg3: memref<8x12xf32, #tpu.memory_space<vmem>>, %arg4: memref<8x128xf32, #tpu.memory_space<vmem>>, %arg5: memref<1x128xf32, #tpu.memory_space<vmem>>, %arg6: memref<8x128xf32, #tpu.memory_space<vmem>>) attributes {dimension_semantics = [#tpu.dimension_semantics<parallel>], iteration_bounds = array<i64: 1>, scalar_prefetch = 0 : i64, scratch_operands = 0 : i64, tpu.core_type = #tpu.core_type<tc>, window_params = [{transform_indices = @transform_0, window_bounds = array<i64: 8, 8>}, {pipeline_mode = #tpu.pipeline_mode<synchronous>, transform_indices = @transform_1, window_bounds = array<i64: 1, 12>}, {transform_indices = @transform_2, window_bounds = array<i64: 8, 12>}, {pipeline_mode = #tpu.pipeline_mode<synchronous>, transform_indices = @transform_3, window_bounds = array<i64: 8, 128>}, {pipeline_mode = #tpu.pipeline_mode<synchronous>, transform_indices = @transform_4, window_bounds = array<i64: 1, 128>}, {transform_indices = @transform_5, window_bounds = array<i64: 8, 128>}]} {
    %c0 = arith.constant 0 : index
    %c0_0 = arith.constant 0 : index
    %0 = vector.load %arg1[%c0, %c0_0] : memref<8x8xf32, #tpu.memory_space<vmem>>, vector<8x8xf32>
    %c0_1 = arith.constant 0 : index
    %c0_2 = arith.constant 0 : index
    %1 = vector.load %arg3[%c0_1, %c0_2] : memref<8x12xf32, #tpu.memory_space<vmem>>, vector<8x12xf32>
    %c0_3 = arith.constant 0 : index
    %c0_4 = arith.constant 0 : index
    %2 = vector.load %arg2[%c0_3, %c0_4] : memref<1x12xf32, #tpu.memory_space<vmem>>, vector<1x12xf32>
    %cst = arith.constant 0.000000e+00 : f32
    %3 = vector.broadcast %cst : f32 to vector<8x12xf32>
    %4 = arith.cmpf ogt, %1, %3 : vector<8x12xf32>
    %5 = vector.shape_cast %2 : vector<1x12xf32> to vector<1x12xf32>
    %6 = vector.broadcast %5 : vector<1x12xf32> to vector<8x12xf32>
    %cst_5 = arith.constant 0xFF800000 : f32
    %7 = vector.broadcast %cst_5 : f32 to vector<8x12xf32>
    %8 = arith.select %4, %6, %7 : vector<8x12xi1>, vector<8x12xf32>
    %cst_6 = arith.constant dense<0xFF800000> : vector<8xf32>
    %9 = vector.multi_reduction <maximumf>, %8, %cst_6 [1] : vector<8x12xf32> to vector<8xf32>
    %10 = vector.shape_cast %9 : vector<8xf32> to vector<8x1xf32>
    %cst_7 = arith.constant 0xFF800000 : f32
    %11 = vector.broadcast %cst_7 : f32 to vector<8x1xf32>
    %12 = arith.cmpf ogt, %10, %11 : vector<8x1xf32>
    %cst_8 = arith.constant 0.000000e+00 : f32
    %13 = vector.broadcast %cst_8 : f32 to vector<8x1xf32>
    %14 = arith.select %12, %10, %13 : vector<8x1xi1>, vector<8x1xf32>
    %c0_9 = arith.constant 0 : index
    %c0_10 = arith.constant 0 : index
    %15 = vector.load %arg4[%c0_9, %c0_10] : memref<8x128xf32, #tpu.memory_space<vmem>>, vector<8x128xf32>
    %cst_11 = arith.constant dense<0.000000e+00> : vector<8x128xf32>
    %16 = tpu.matmul %0, %15, %cst_11 {dimension_numbers = #tpu.dot_dimension_numbers<[1], [0], [0], [1], [0, 0, 1, 1], [], []>} : vector<8x8xf32>, vector<8x128xf32>, vector<8x128xf32> -> vector<8x128xf32>
    %c0_12 = arith.constant 0 : index
    %c0_13 = arith.constant 0 : index
    %17 = vector.load %arg5[%c0_12, %c0_13] : memref<1x128xf32, #tpu.memory_space<vmem>>, vector<1x128xf32>
    %18 = vector.broadcast %14 : vector<8x1xf32> to vector<8x128xf32>
    %19 = vector.broadcast %17 : vector<1x128xf32> to vector<8x128xf32>
    %20 = arith.mulf %18, %19 : vector<8x128xf32>
    %21 = arith.addf %16, %20 : vector<8x128xf32>
    %cst_14 = arith.constant 0.000000e+00 : f32
    %22 = vector.broadcast %cst_14 : f32 to vector<8x128xf32>
    %23 = arith.maximumf %21, %22 : vector<8x128xf32>
    %c0_15 = arith.constant 0 : index
    %c0_16 = arith.constant 0 : index
    %24 = vector.load %arg6[%c0_15, %c0_16] : memref<8x128xf32, #tpu.memory_space<vmem>>, vector<8x128xf32>
    tpu.vector_store %arg6[%c0_15, %c0_16], %23 {strides = array<i32>} : memref<8x128xf32, #tpu.memory_space<vmem>>, vector<8x128xf32>,
    return
  }
  func.func @transform_0(%arg0: i32) -> (i32, i32) {
    %c0_i32 = arith.constant 0 : i32
    %c0_i32_0 = arith.constant 0 : i32
    return %arg0, %c0_i32 : i32, i32
  }
  func.func @transform_1(%arg0: i32) -> (i32, i32) {
    %c0_i32 = arith.constant 0 : i32
    %c0_i32_0 = arith.constant 0 : i32
    %c0_i32_1 = arith.constant 0 : i32
    return %c0_i32, %c0_i32_0 : i32, i32
  }
  func.func @transform_2(%arg0: i32) -> (i32, i32) {
    %c0_i32 = arith.constant 0 : i32
    %c0_i32_0 = arith.constant 0 : i32
    return %arg0, %c0_i32 : i32, i32
  }
  func.func @transform_3(%arg0: i32) -> (i32, i32) {
    %c0_i32 = arith.constant 0 : i32
    %c0_i32_0 = arith.constant 0 : i32
    %c0_i32_1 = arith.constant 0 : i32
    return %c0_i32, %c0_i32_0 : i32, i32
  }
  func.func @transform_4(%arg0: i32) -> (i32, i32) {
    %c0_i32 = arith.constant 0 : i32
    %c0_i32_0 = arith.constant 0 : i32
    %c0_i32_1 = arith.constant 0 : i32
    return %c0_i32, %c0_i32_0 : i32, i32
  }
  func.func @transform_5(%arg0: i32) -> (i32, i32) {
    %c0_i32 = arith.constant 0 : i32
    %c0_i32_0 = arith.constant 0 : i32
    return %arg0, %c0_i32 : i32, i32
  }
}

</mosaic_0001>

<bundles_post_ra>
// kernel: gnn_dual_layer.2
= control target key start
LH: loop header
LB: loop body
LE: loop exit
PB: predicated region body
PF: predicated region fallthrough
CT: control target
= control target key end

     0   :  { %vm47_vm0 = vcmask 64512   ;;  %v174_v3 = vmov 0.0   ;;  %vm175_vm1 = vmmov 0   ;;  %vm32_vm3 = vcmask 97280   ;;  %s234_s0 = inlined_call_operand.vmem [shape: f32[8,8], index: 0, kind: input, shape index: {}]   ;;  %s235_s1 = inlined_call_operand.vmem [shape: f32[1,12], index: 1, kind: input, shape index: {}]   ;;  %s236_s2 = inlined_call_operand.vmem [shape: f32[8,12], index: 2, kind: input, shape index: {}]   ;;  %s237_s3 = inlined_call_operand.vmem [shape: f32[8,128], index: 3, kind: input, shape index: {}]   ;;  %s238_s4 = inlined_call_operand.vmem [shape: f32[1,128], index: 4, kind: input, shape index: {}]   ;;  %s239_s5 = inlined_call_operand.hbm [shape: f32[8,128], index: 5, kind: output, shape index: {}]  }
   0x1   :  { %v38_v0 = vld [vmem:[%s237_s3] sm:$0xff]  ;;  %142 = vmatprep.subr.mxu0 %v174_v3  ;;  %144 = vmatprep.mubr.msk.f32.mxu0 %vm175_vm1, %v174_v3 }
   0x2   :  { %v21_v1 = vld [vmem:[%s234_s0] sm:$0xff] }
   0x3   :  { %v22_v2 = vld [vmem:[%s236_s2] sm:$0xff] }
   0x4   :  { %v137_v4 = vld [vmem:[%s235_s1] ss:$0 sm:$0xff]  ;;  %vm24_vm2 = vcmp.gt.f32.partialorder %v22_v2, 0.0 }
   0x5   :  { %10 = vsyncpa [#allocation3], 0  ;;  %143 = vmatpush3.msra.mxu0 %v38_v0  ;;  %v31_v5 = vsel %vm24_vm2, %v137_v4, -inf  ;;  %v138_v9 = vld [vmem:[%s238_s4] ss:$0 sm:$0xff]  ;;  %s176_s3 = smov [#allocation2]  }
   0x6   :  { %145 = vmatmul.mubr.msk.f32.vlgmr.msra.gmra.mrb[0].mxu0 %vm47_vm0, %v21_v1  ;;  %v33_v6 = vsel %vm32_vm3, %v31_v5, -inf  ;;  %s129_s26 = sshll.u32 %s176_s3, 4  ;;  %s130_s26 = int_to_ptr.vmem [resolvable:$true] %s129_s26 }
   0x7   :  { %34 = vmax.xlane.f32.xlu0 %v33_v6  ;;  %s150_s1 = scalar_lea.vmem %s130_s26, 128  ;;  %p155_p1 = scmp.lt.s32.totalorder %s130_s26, %s130_s26 }
   0x8   :  { %p151_p0 = scmp.ne.s32.totalorder %s130_s26, %s150_s1  ;;  %p156_p2 = scmp.lt.s32.totalorder %s150_s1, %s150_s1 }
   0xa   :  { %p157_p3 = por %p156_p2, %p155_p1 }
   0xc   :  { %p158_p4 = pnand %p157_p3, %p151_p0 }
  0x94   :  { %v35_v7 = vpop.xlane.xlu0 %34 }
  0x95   :  { %vm36_vm4 = vcmp.gt.f32.partialorder %v35_v7, -inf }
  0x96   :  { %v37_v8 = vsel %vm36_vm4, %v35_v7, 0.0 }
  0x97   :  { %v46_v10 = vmul.f32 %v138_v9, %v37_v8 }
  0xd9   :  { %v117_v11 = vpop.f32.mrb[0].mxu0 }
  0xda   :  { %v118_v12 = vadd.f32 %v117_v11, %v46_v10  ;;  %v146_v13 = vpop.f32.mrb[1].mxu0 }
  0xdc   :  { %v121_v14 = vmax.f32 %v118_v12, 0.0 }
  0xde   :  { %122 = vst [vmem:[#allocation2] sm:$0xff] %v121_v14 }
  0xdf   :  { %161 = shalt.err (!%p158_p4)
}
  0xe0   :  { %s162_s4 = scalar_lea.hbm %s239_s5, 128 }
  0xe1   :  { %p163_p5 = scmp.ne.s32.totalorder %s239_s5, %s162_s4  ;;  %p166_p6 = scmp.lt.u32.totalorder %s162_s4, %s239_s5 }
  0xe3   :  { %p168_p7 = pnand %p166_p6, %p163_p5 }
  0xe5   :  { %171 = shalt.err (!%p168_p7)
}
  0xe6   :  { %132 = dma.vmem_to_hbm [thread:$0]  %s130_s26, 128, %s239_s5, [#allocation3]  }
  0xe7   :  { %172 = dma.done.wait [#allocation3], 128  }
  0xe8   :  { %173 = vsyncadd [#allocation3], 4294967168 }
  0xe9   :  { %136 = vsyncpa [#allocation3], 1 }

// kernel: gnn_dual_layer.3
= control target key start
LH: loop header
LB: loop body
LE: loop exit
PB: predicated region body
PF: predicated region fallthrough
CT: control target
= control target key end

     0   :  { %10 = vsyncpa [#allocation3], 0  ;;  %s692_s0 = inlined_call_operand.vmem [shape: f32[12,8], index: 0, kind: input, shape index: {}]   ;;  %s693_s1 = inlined_call_operand.vmem [shape: f32[1,8], index: 1, kind: input, shape index: {}]   ;;  %s694_s2 = inlined_call_operand.vmem [shape: f32[12,8], index: 2, kind: input, shape index: {}]   ;;  %s695_s3 = inlined_call_operand.vmem [shape: f32[8,128], index: 3, kind: input, shape index: {}]   ;;  %s696_s4 = inlined_call_operand.vmem [shape: f32[1,128], index: 4, kind: input, shape index: {}]   ;;  %s697_s5 = inlined_call_operand.hbm [shape: f32[12,128], index: 5, kind: output, shape index: {}]  }
   0x1   :  { %12 = vsyncpa [#allocation3 + $0x1], 0  ;;  %s580_s18 = smov 0   ;;  %s582_s19 = smov 0  }
   0x2   :  { %s584_s20 = smov 0   ;;  %s586_s21 = smov 0  }
   0x3 LB: > { %s601_s22 = sadd.s32 4294967295, %s545_s21   ;;  %s421_s23 = sadd.s32 4294967294, %s545_s21   ;;  %s545_s21 = sphi %s586_s21, %s703_s21   ;;  %s541_s20 = sphi %s584_s20, %s702_s20   ;;  %s537_s19 = sphi %s582_s19, %s701_s19   ;;  %s533_s18 = sphi %s580_s18, %s700_s18  }
   0x4   : > { %s605_s24 = sadd.s32 1, %s545_s21   ;;  %s140_s25 = sadd.s32 1, %s541_s20 }
   0x5   : > { %s137_s26 = ssub.s32 %s545_s21, %s605_s24  ;;  %p150_p0 = scmp.ne.s32.totalorder %s541_s20, %s537_s19 }
   0x6   : > { %p138_p1 = scmp.eq.s32.totalorder %s137_s26, 0  ;;  %p151_p2 = scmp.eq.s32.totalorder %s601_s22, 1 }
   0x7   : > { %p156_p3 = scmp.ne.s32.totalorder %s537_s19, %s533_s18  ;;  %p157_p4 = scmp.eq.s32.totalorder %s421_s23, 1 }
   0x8   : > { %s616_s27 = scalar_select %p138_p1, %s541_s20, %s140_s25  }
   0x9   : > { %p618_p5 = por %p151_p2, %p150_p0  ;;  %p622_p6 = por %p157_p4, %p156_p3 }
   0xa   : > { %p424_p7 = scmp.ge.s32.totalorder %s545_s21, 1  ;;  %p198_p8 = scmp.lt.s32.totalorder %s545_s21, 3 }
   0xc   : > { %p199_p9 = pnand %p424_p7, %p198_p8 }
   0xd   : > { %v252_v0 = vld [vmem:[%s695_s3] sm:$0xff] (!%p199_p9)  ;;  %p229_p10 = scmp.lt.s32.totalorder (!%p199_p9), %s601_s22, 1  ;;  %v547_v1 = vmov (!%p199_p9), 0.0   ;;  %vm548_vm0 = vmmov (!%p199_p9), 0   ;;  %vm248_vm1 = vcmask (!%p199_p9), 64512   ;;  %s226_s17 = sand.u32 (!%p199_p9), 1, %s537_s19  }
   0xe   : > { %202 = sbr.rel (%p199_p9) target bundleno = 256 (0x100), region = 40  ;;  %437 = vmatprep.subr.mxu0 (!%p199_p9), %v547_v1  ;;  %439 = vmatprep.mubr.msk.f32.mxu0 (!%p199_p9), %vm548_vm0, %v547_v1  ;;  %v428_v2 = vld [vmem:[%s693_s1] ss:$0 sm:$0xff] (!%p199_p9)  ;;  %s425_s26 = sshll.u32 (!%p199_p9), %s226_s17, 3 }
   0xf   : > { %438 = vmatpush3.msra.mxu0 (!%p199_p9), %v252_v0  ;;  %v429_v8 = vld [vmem:[%s696_s4] ss:$0 sm:$0xff] (!%p199_p9)  ;;  %s432_s30 = sshll.u32 (!%p199_p9), %s601_s22, 7  ;;  %s228_s6 = scalar_lea.vmem (!%p199_p9), [#allocation2], %s425_s26 }
  0x10   : > { %s650_s10 = scalar_lea.hbm (!%p199_p9), %s697_s5, %s432_s30 }
  0x15   : > { %s230_s7 = scalar_select %p229_p10, %s601_s22, 1 }
  0x16   : > { %s549_s22 = smov [#allocation2]  }
  0x17   : > { %s426_s8 = sshll.u32 %s230_s7, 3  ;;  %s350_s7 = sshll.u32 %s228_s6, 4  ;;  %s652_s7 = int_to_ptr.vmem [resolvable:$true] %s350_s7 }
  0x18   : > { %s232_s11 = scalar_lea.vmem %s692_s0, %s426_s8  ;;  %s236_s14 = scalar_lea.vmem %s694_s2, %s426_s8 }
  0x19   : > { %v237_v3 = vld [vmem:[%s232_s11] sm:$0xff]  ;;  %s337_s11 = scalar_lea.sflag [#allocation3], %s226_s17  ;;  %s483_s12 = scalar_lea.vmem %s652_s7, 128 }
  0x1a   : > { %v238_v4 = vld [vmem:[%s236_s14] sm:$0xff]  ;;  %440 = vmatmul.mubr.msk.f32.vlgmr.msra.gmra.mrb[0].mxu0 %vm248_vm1, %v237_v3  ;;  %p484_p11 = scmp.ne.s32.totalorder %s652_s7, %s483_s12  ;;  %s487_s13 = sshll.u32 %s549_s22, 4  ;;  %s488_s13 = int_to_ptr.vmem [resolvable:$false] %s487_s13 }
  0x1b   : > { %vm240_vm2 = vcmp.gt.f32.partialorder %v238_v4, 0.0  ;;  %s489_s14 = scalar_lea.vmem %s488_s13, 256  ;;  %p490_p0 = scmp.lt.s32.totalorder %s652_s7, %s488_s13 }
  0x1c   : > { %v247_v5 = vsel %vm240_vm2, %v428_v2, 0.0  ;;  %p485_p12 = pnand %p484_p11, %p618_p5  ;;  %p491_p1 = scmp.lt.s32.totalorder %s489_s14, %s483_s12 }
  0x1d   : > { %v249_v6 = vsel %vm248_vm1, %v247_v5, 0.0 }
  0x1e   : > { %250 = vadd.xlane.f32.xlu0 %v249_v6  ;;  %p486_p13 = pneg %p485_p12  ;;  %p492_p2 = por %p491_p1, %p490_p0 }
  0x20   : > { %p493_p3 = pnand %p492_p2, %p486_p13 }
  0xab   : > { %v251_v7 = vpop.xlane.xlu0 %250 }
  0xac   : > { %v260_v9 = vmul.f32 %v429_v8, %v251_v7 }
  0xed   : > { %v330_v10 = vpop.f32.mrb[0].mxu0 }
  0xee   : > { %v331_v11 = vadd.f32 %v330_v10, %v260_v9  ;;  %v441_v12 = vpop.f32.mrb[1].mxu0 }
  0xf0   : > { %v334_v13 = vmax.f32 %v331_v11, 0.0 }
  0xf2   : > { %335 = vst [vmem:[%s228_s6] sm:$0xff] %v334_v13 }
  0xf3   : > { %496 = shalt.err (!%p493_p3)
}
  0xf4   : > { %s497_s15 = scalar_lea.hbm %s650_s10, 128  ;;  %s501_s23 = scalar_lea.hbm %s697_s5, 256 }
  0xf5   : > { %p498_p4 = scmp.ne.s32.totalorder %s650_s10, %s497_s15  ;;  %p502_p9 = scmp.lt.u32.totalorder %s650_s10, %s697_s5 }
  0xf6   : > { %p503_p10 = scmp.lt.u32.totalorder %s501_s23, %s497_s15  ;;  %p505_p12 = scmp.lt.u32.totalorder %s497_s15, %s650_s10 }
  0xf7   : > { %p499_p7 = pnand %p498_p4, %p618_p5 }
  0xf8   : > { %p504_p11 = por %p503_p10, %p502_p9 }
  0xf9   : > { %p500_p8 = pneg %p499_p7 }
  0xfa   : > { %p506_p13 = por %p505_p12, %p504_p11 }
  0xfc   : > { %p507_p0 = pnand %p506_p13, %p500_p8 }
  0xfe   : > { %510 = shalt.err (!%p507_p0)
}
  0xff   : > { %442 = dma.vmem_to_hbm [thread:$0]  (%p618_p5), %s652_s7, 128, %s650_s10, %s337_s11  }
 0x100 PF: > { %p448_p1 = scmp.ge.s32.totalorder %s545_s21, 2  ;;  %s362_s30 = sand.u32 1, %s533_s18  }
 0x101   : > { %s363_s6 = scalar_lea.sflag [#allocation3], %s362_s30 }
 0x102   : > { %p445_p2 = pnand %p448_p1, %p622_p6 }
 0x104   : > { %528 = dma.done.wait (!%p445_p2), %s363_s6, 128  }
 0x105   : > { %530 = vsyncadd (!%p445_p2), %s363_s6, 4294967168  ;;  %p15_p3 = scmp.ge.s32.totalorder %s605_s24, 4   ;;  %s700_s18 = smov %s537_s19 }
 0x106   : > { %s701_s19 = smov %s541_s20  ;;  %s702_s20 = smov %s616_s27 }
 0x107   : > { %s703_s21 = smov %s605_s24  ;;  %17 = sbr.rel (!%p15_p3) target bundleno = 3 (0x3), region = 78 }
 0x10e   :  { %368 = vsyncpa [#allocation3], 1 }
 0x10f   :  { %370 = vsyncpa [#allocation3 + $0x1], 1 }

</bundles_post_ra>
